<compile_context>
chip_gen: v7x
topology: tpu7x:2x2x1
jax: 0.10.0
libtpu: 0.0.40
codegen_flags: <defaults>
</compile_context>

<pallas_src>
import functools

import numpy as np

import jax
import jax.numpy as jnp
from jax.experimental import pallas as pl
from jax.experimental.pallas import tpu as pltpu

BN_EPS = 1e-5          # nn.BatchNorm2d default
LEAKY_SLOPE = 0.01     # nn.LeakyReLU default
KSIZE = 3
STRIDE = 2
PAD = 1


def calc_output_padding_2d(shape):
    """output_padding so ConvTranspose2d(k=3, s=2, p=1) hits the target spatial shape."""
    _, h, w = shape
    return ((h + 1) % 2, (w + 1) % 2)


# --------------------------- fused Pallas kernel -----------------------------

def _dot_f32_exactish(a_f32, b01_bf16):
    """a (f32) @ b, where b is exact in bf16 (0/1 matrices).

    Two bf16 MXU passes (hi/lo split of `a`) with f32 accumulation give ~2^-17 relative
    error, i.e. effectively f32 statistics, explicitly and at known cost (2 passes).
    """
    a_hi = a_f32.astype(jnp.bfloat16)
    a_lo = (a_f32 - a_hi.astype(jnp.float32)).astype(jnp.bfloat16)
    return (jnp.dot(a_hi, b01_bf16, preferred_element_type=jnp.float32)
            + jnp.dot(a_lo, b01_bf16, preferred_element_type=jnp.float32))


def _decoder_kernel(*refs, inv_counts, n_layers):
    """refs = (x, [T, G, GB] * n_layers, GHEAD, DUR, out).

    x    : (N, H0*W0*C0)  f32   input, rows = sample, lanes = (h, w, c), c fastest
    T    : (Li, Lo)       bf16  ConvTranspose2d fully folded (H/W scatter + channel mix)
    G    : (Lo, Lo)       bf16  0/1 same-channel matrix: lane->channel sum + broadcast
    GB   : (2, Lo)        f32   [gamma; beta] pre-tiled to lanes
    GHEAD: (L, L)         bf16  0/1 same-(sample-row h) matrix for the softmax denominator
    DUR  : (1, L)         f32   1.0 on duration lanes (last W position of each row group)
    out  : (N, L)         f32
    """
    x_ref = refs[0]
    ghead_ref = refs[1 + 3 * n_layers]
    dur_ref = refs[2 + 3 * n_layers]
    o_ref = refs[-1]

    y = x_ref[...].astype(jnp.float32)

    for l in range(n_layers):
        t_ref, g_ref, gb_ref = refs[1 + 3 * l:1 + 3 * (l + 1)]

        # ---- ConvTranspose2d: ONE bf16 MXU matmul against the prefolded kernel T ----
        # (conv bias omitted on purpose: exactly cancelled by training-mode BatchNorm)
        y = jnp.dot(y.astype(jnp.bfloat16), t_ref[...],
                    preferred_element_type=jnp.float32)

        # ---- BatchNorm2d, training mode, batch stats, biased variance (single pass) ----
        s1 = jnp.sum(y, axis=0, keepdims=True)           # (1, Lo) per-lane sums
        s2 = jnp.sum(y * y, axis=0, keepdims=True)       # (1, Lo) per-lane sums of squares
        stats = jnp.concatenate([s1, s2], axis=0)        # (2, Lo)
        tot = _dot_f32_exactish(stats, g_ref[...])       # per-channel totals, already lane-broadcast
        mean_l = tot[0:1, :] * inv_counts[l]
        var_l = tot[1:2, :] * inv_counts[l] - mean_l * mean_l
        gb = gb_ref[...]
        scale_l = gb[0:1, :] * jax.lax.rsqrt(var_l + BN_EPS)
        shift_l = gb[1:2, :] - mean_l * scale_l
        y = y * scale_l + shift_l

        if l < n_layers - 1:                             # last layer: BN only, no LeakyReLU
            y = jnp.where(y >= 0.0, y, LEAKY_SLOPE * y)

    # ---- head: per-(sample, image-row) log_softmax over W-1 lanes, log(sigmoid) on last ----
    is_dur = dur_ref[...] > 0.5                          # (1, L), broadcasts over rows
    masked = jnp.where(is_dur, -1e30, y)
    m = jnp.max(masked, axis=-1, keepdims=True)          # per-sample max: valid upper bound
    e = jnp.where(is_dur, 0.0, jnp.exp(masked - m))
    denom = _dot_f32_exactish(e, ghead_ref[...])         # per-row-group sums, lane-broadcast
    lse = jnp.log(denom + 1e-30) + m                     # +tiny: guards pathological underflow
    log_probs = y - lse
    # log(sigmoid(y)) == -softplus(-y), computed stably with exp/log/abs/min only
    log_dur = jnp.minimum(y, 0.0) - jnp.log(1.0 + jnp.exp(-jnp.abs(y)))
    o_ref[...] = jnp.where(is_dur, log_dur, log_probs)


# ------------------------------- constants (built ONCE) ----------------------

def _fold_conv_transpose(weight, h_in, w_in, h_out, w_out):
    """Fold ConvTranspose2d(k=3, s=2, p=1, output_padding) into one dense matrix.

    T[(hi*Wi + wi)*Ci + ci, (ho*Wo + wo)*Co + co] = sum_{kh,kw valid} weight[ci, co, kh, kw]
    """
    c_in, c_out, kh_sz, kw_sz = weight.shape
    assert kh_sz == KSIZE and kw_sz == KSIZE
    wgt = np.asarray(weight, np.float32)
    t = np.zeros((h_in * w_in * c_in, h_out * w_out * c_out), np.float32)
    for ih in range(h_in):
        for iw in range(w_in):
            r0 = (ih * w_in + iw) * c_in
            for kh in range(KSIZE):
                oh = STRIDE * ih - PAD + kh
                if not 0 <= oh < h_out:
                    continue
                for kw in range(KSIZE):
                    ow = STRIDE * iw - PAD + kw
                    if not 0 <= ow < w_out:
                        continue
                    c0 = (oh * w_out + ow) * c_out
                    t[r0:r0 + c_in, c0:c0 + c_out] += wgt[:, :, kh, kw]
    return t


def build_decoder_constants(params, batch, in_shape):
    """Precompute every constant kernel operand exactly once (hoisted out of forward)."""
    c_in, h_in, w_in = in_shape
    flat, inv_counts = [], []
    ci, hi, wi = c_in, h_in, w_in
    for p in params:
        wgt = np.asarray(p["weight"], np.float32)
        assert wgt.shape[0] == ci
        co = wgt.shape[1]
        oph, opw = p["output_padding"]
        ho = (hi - 1) * STRIDE - 2 * PAD + KSIZE + oph
        wo = (wi - 1) * STRIDE - 2 * PAD + KSIZE + opw

        t = jnp.asarray(_fold_conv_transpose(wgt, hi, wi, ho, wo), jnp.bfloat16)
        lane_ch = np.arange(ho * wo * co) % co                       # channel id per lane
        g = jnp.asarray((lane_ch[:, None] == lane_ch[None, :]).astype(np.float32),
                        jnp.bfloat16)                                # exact 0/1 in bf16
        gamma_l = np.tile(np.asarray(p["gamma"], np.float32), ho * wo)
        beta_l = np.tile(np.asarray(p["beta"], np.float32), ho * wo)
        gb = jnp.asarray(np.stack([gamma_l, beta_l]), jnp.float32)   # (2, Lo)

        flat += [t, g, gb]
        inv_counts.append(1.0 / float(batch * ho * wo))
        ci, hi, wi = co, ho, wo

    assert ci == 1, "decoder must end with a single channel (it is squeezed)"
    l_last = hi * wi
    grp = np.arange(l_last) // wi                                    # image-row id per lane
    ghead = jnp.asarray((grp[:, None] == grp[None, :]).astype(np.float32), jnp.bfloat16)
    dur_mask = jnp.asarray(((np.arange(l_last) % wi) == wi - 1).astype(np.float32)[None, :])
    flat += [ghead, dur_mask]
    return flat, tuple(inv_counts), (hi, wi)


# ------------------------------- public forward ------------------------------

def make_decoder_forward(params, *, batch, in_shape, encoded_size):
    """Build constants once and return a jitted forward(hidden: (N, C, H, W)) -> (N, H_out, W_out)."""
    consts, inv_counts, (h_out, w_out) = build_decoder_constants(params, batch, in_shape)
    assert w_out == encoded_size
    n_layers = len(params)
    c_in, h_in, w_in = in_shape
    l_last = h_out * w_out

    kernel = functools.partial(_decoder_kernel, inv_counts=inv_counts, n_layers=n_layers)

    def _spec(a):
        return pl.BlockSpec(a.shape, lambda i: (0, 0))

    @jax.jit
    def forward(hidden, *const_args):
        # single boundary layout change: NCHW -> rows = sample, lanes = (h, w, c)
        x = jnp.transpose(hidden, (0, 2, 3, 1)).reshape(batch, h_in * w_in * c_in)
        x = x.astype(jnp.float32)
        flat_inputs = (x,) + const_args
        out2d = pl.pallas_call(
            kernel,
            grid=(1,),
            in_specs=[_spec(a) for a in flat_inputs],
            out_specs=pl.BlockSpec((batch, l_last), lambda i: (0, 0)),
            out_shape=jax.ShapeDtypeStruct((batch, l_last), jnp.float32),
            compiler_params=pltpu.CompilerParams(dimension_semantics=("arbitrary",)),
        )(*flat_inputs)
        return out2d.reshape(batch, h_out, w_out)   # lanes were (h, w): free reshape

    return lambda hidden: forward(hidden, *consts)


def init_decoder_params(key, target_shapes_reversed, kernel_size=(3, 3)):
    """Deterministic synthetic parameters; shapes follow Decoder.__init__."""
    params = []
    for i in range(len(target_shapes_reversed) - 1):
        c_in = target_shapes_reversed[i][0]
        c_out = target_shapes_reversed[i + 1][0]
        key, kw_, kb_ = jax.random.split(key, 3)
        weight = 0.1 * jax.random.normal(kw_, (c_in, c_out, *kernel_size), jnp.float32)
        bias = 0.1 * jax.random.normal(kb_, (c_out,), jnp.float32)
        gamma = jnp.ones((c_out,), jnp.float32)   # BatchNorm2d default affine init
        beta = jnp.zeros((c_out,), jnp.float32)
        params.append(dict(
            weight=weight, bias=bias, gamma=gamma, beta=beta,
            output_padding=calc_output_padding_2d(target_shapes_reversed[i + 1])))
    return params


# ------------------------- pure-JAX reference (self-check) -------------------

def _reference_forward(hidden, params):
    y = hidden
    n_layers = len(params)
    for li, p in enumerate(params):
        wgt = p["weight"]
        oph, opw = p["output_padding"]
        w_conv = jnp.flip(wgt, (2, 3)).transpose(1, 0, 2, 3)      # (Cout, Cin, K, K)
        y = jax.lax.conv_general_dilated(
            y, w_conv, window_strides=(1, 1),
            padding=[(KSIZE - 1 - PAD, KSIZE - 1 - PAD + oph),
                     (KSIZE - 1 - PAD, KSIZE - 1 - PAD + opw)],
            lhs_dilation=(STRIDE, STRIDE), rhs_dilation=(1, 1),
            dimension_numbers=("NCHW", "OIHW", "NCHW"))
        y = y + p["bias"][None, :, None, None]
        mean = jnp.mean(y, axis=(0, 2, 3), keepdims=True)
        var = jnp.mean((y - mean) ** 2, axis=(0, 2, 3), keepdims=True)
        y = (y - mean) * jax.lax.rsqrt(var + BN_EPS)
        y = y * p["gamma"][None, :, None, None] + p["beta"][None, :, None, None]
        if li < n_layers - 1:
            y = jnp.where(y >= 0, y, LEAKY_SLOPE * y)
    y = y[:, 0, :, :]
    acts, dur = y[..., :-1], y[..., -1:]
    return jnp.concatenate(
        [jax.nn.log_softmax(acts, axis=-1), jax.nn.log_sigmoid(dur)], axis=-1)


if __name__ == "__main__":
    key = jax.random.PRNGKey(0)

    # Small config consistent with the module:
    #   encoder target_shapes (shallow -> deep): (1, 8, 12) -> (8, 4, 6) -> (16, 2, 3)
    #   => 2 ConvTranspose layers in the decoder; encoded_size (== hidden_size) = 12
    encoded_size = 12
    target_shapes = [(1, 8, 12), (8, 4, 6), (16, 2, 3)]
    target_shapes_rev = list(reversed(target_shapes))   # Decoder.__init__ reverses

    k_in, k_p = jax.random.split(key)
    params = init_decoder_params(k_p, target_shapes_rev)

    n = 2
    c, h, w = target_shapes_rev[0]                      # decoder input: (N, 16, 2, 3)
    hidden = jax.random.normal(k_in, (n, c, h, w), jnp.float32)

    forward = make_decoder_forward(params, batch=n, in_shape=(c, h, w),
                                   encoded_size=encoded_size)
    out = jax.block_until_ready(forward(hidden))
    assert out.shape == (n, target_shapes[0][1], encoded_size)
    assert bool(jnp.all(jnp.isfinite(out)))

    ref = _reference_forward(hidden, params)
    err = jnp.abs(out - ref)
    max_err = float(jnp.max(err))
    mean_err = float(jnp.mean(err))
    # tolerance reflects the intentional single-pass bf16 conv matmuls (stats/head are ~f32)
    assert max_err < 0.07, f"max mismatch vs reference: {max_err}"
    assert mean_err < 0.02, f"mean mismatch vs reference: {mean_err}"
    print("KERNEL_OK")
</pallas_src>

<mosaic_0001>
module attributes {stable_mosaic.version = 11 : i64} {
  func.func @_decoder_kernel(%arg0: i32, %arg1: memref<2x96xf32, #tpu.memory_space<vmem>>, %arg2: memref<96x192xbf16, #tpu.memory_space<vmem>>, %arg3: memref<192x192xbf16, #tpu.memory_space<vmem>>, %arg4: memref<2x192xf32, #tpu.memory_space<vmem>>, %arg5: memref<192x96xbf16, #tpu.memory_space<vmem>>, %arg6: memref<96x96xbf16, #tpu.memory_space<vmem>>, %arg7: memref<2x96xf32, #tpu.memory_space<vmem>>, %arg8: memref<96x96xbf16, #tpu.memory_space<vmem>>, %arg9: memref<1x96xf32, #tpu.memory_space<vmem>>, %arg10: memref<2x96xf32, #tpu.memory_space<vmem>>) attributes {dimension_semantics = [#tpu.dimension_semantics<arbitrary>], iteration_bounds = array<i64: 1>, scalar_prefetch = 0 : i64, scratch_operands = 0 : i64, tpu.core_type = #tpu.core_type<tc>, window_params = [{pipeline_mode = #tpu.pipeline_mode<synchronous>, transform_indices = @transform_0, window_bounds = array<i64: 2, 96>}, {pipeline_mode = #tpu.pipeline_mode<synchronous>, transform_indices = @transform_1, window_bounds = array<i64: 96, 192>}, {pipeline_mode = #tpu.pipeline_mode<synchronous>, transform_indices = @transform_2, window_bounds = array<i64: 192, 192>}, {pipeline_mode = #tpu.pipeline_mode<synchronous>, transform_indices = @transform_3, window_bounds = array<i64: 2, 192>}, {pipeline_mode = #tpu.pipeline_mode<synchronous>, transform_indices = @transform_4, window_bounds = array<i64: 192, 96>}, {pipeline_mode = #tpu.pipeline_mode<synchronous>, transform_indices = @transform_5, window_bounds = array<i64: 96, 96>}, {pipeline_mode = #tpu.pipeline_mode<synchronous>, transform_indices = @transform_6, window_bounds = array<i64: 2, 96>}, {pipeline_mode = #tpu.pipeline_mode<synchronous>, transform_indices = @transform_7, window_bounds = array<i64: 96, 96>}, {pipeline_mode = #tpu.pipeline_mode<synchronous>, transform_indices = @transform_8, window_bounds = array<i64: 1, 96>}, {pipeline_mode = #tpu.pipeline_mode<synchronous>, transform_indices = @transform_9, window_bounds = array<i64: 2, 96>}]} {
    %c0 = arith.constant 0 : index
    %c0_0 = arith.constant 0 : index
    %0 = vector.load %arg1[%c0, %c0_0] : memref<2x96xf32, #tpu.memory_space<vmem>>, vector<2x96xf32>
    %1 = arith.truncf %0 : vector<2x96xf32> to vector<2x96xbf16>
    %c0_1 = arith.constant 0 : index
    %c0_2 = arith.constant 0 : index
    %2 = vector.load %arg2[%c0_1, %c0_2] : memref<96x192xbf16, #tpu.memory_space<vmem>>, vector<96x192xbf16>
    %cst = arith.constant dense<0.000000e+00> : vector<2x192xf32>
    %3 = tpu.matmul %1, %2, %cst {dimension_numbers = #tpu.dot_dimension_numbers<[1], [0], [0], [1], [0, 0, 1, 1], [], []>} : vector<2x96xbf16>, vector<96x192xbf16>, vector<2x192xf32> -> vector<2x192xf32>
    %cst_3 = arith.constant dense<0.000000e+00> : vector<192xf32>
    %4 = vector.multi_reduction <add>, %3, %cst_3 [0] : vector<2x192xf32> to vector<192xf32>
    %5 = vector.shape_cast %4 : vector<192xf32> to vector<1x192xf32>
    %6 = arith.mulf %3, %3 : vector<2x192xf32>
    %cst_4 = arith.constant dense<0.000000e+00> : vector<192xf32>
    %7 = vector.multi_reduction <add>, %6, %cst_4 [0] : vector<2x192xf32> to vector<192xf32>
    %8 = vector.shape_cast %7 : vector<192xf32> to vector<1x192xf32>
    %9 = tpu.concatenate %5, %8 in 0 : vector<1x192xf32>, vector<1x192xf32> -> vector<2x192xf32>
    %c0_5 = arith.constant 0 : index
    %c0_6 = arith.constant 0 : index
    %10 = vector.load %arg3[%c0_5, %c0_6] : memref<192x192xbf16, #tpu.memory_space<vmem>>, vector<192x192xbf16>
    %11 = arith.truncf %9 : vector<2x192xf32> to vector<2x192xbf16>
    %12 = arith.extf %11 : vector<2x192xbf16> to vector<2x192xf32>
    %13 = arith.subf %9, %12 : vector<2x192xf32>
    %14 = arith.truncf %13 : vector<2x192xf32> to vector<2x192xbf16>
    %cst_7 = arith.constant dense<0.000000e+00> : vector<2x192xf32>
    %15 = tpu.matmul %11, %10, %cst_7 {dimension_numbers = #tpu.dot_dimension_numbers<[1], [0], [0], [1], [0, 0, 1, 1], [], []>} : vector<2x192xbf16>, vector<192x192xbf16>, vector<2x192xf32> -> vector<2x192xf32>
    %cst_8 = arith.constant dense<0.000000e+00> : vector<2x192xf32>
    %16 = tpu.matmul %14, %10, %cst_8 {dimension_numbers = #tpu.dot_dimension_numbers<[1], [0], [0], [1], [0, 0, 1, 1], [], []>} : vector<2x192xbf16>, vector<192x192xbf16>, vector<2x192xf32> -> vector<2x192xf32>
    %17 = arith.addf %15, %16 : vector<2x192xf32>
    %18 = vector.extract_strided_slice %17 {offsets = [0, 0], sizes = [1, 192], strides = [1, 1]} : vector<2x192xf32> to vector<1x192xf32>
    %cst_9 = arith.constant 0.020833334 : f32
    %19 = vector.broadcast %cst_9 : f32 to vector<1x192xf32>
    %20 = arith.mulf %18, %19 : vector<1x192xf32>
    %21 = vector.extract_strided_slice %17 {offsets = [1, 0], sizes = [1, 192], strides = [1, 1]} : vector<2x192xf32> to vector<1x192xf32>
    %cst_10 = arith.constant 0.020833334 : f32
    %22 = vector.broadcast %cst_10 : f32 to vector<1x192xf32>
    %23 = arith.mulf %21, %22 : vector<1x192xf32>
    %24 = arith.mulf %20, %20 : vector<1x192xf32>
    %25 = arith.subf %23, %24 : vector<1x192xf32>
    %c0_11 = arith.constant 0 : index
    %c0_12 = arith.constant 0 : index
    %26 = vector.load %arg4[%c0_11, %c0_12] : memref<2x192xf32, #tpu.memory_space<vmem>>, vector<2x192xf32>
    %27 = vector.extract_strided_slice %26 {offsets = [0, 0], sizes = [1, 192], strides = [1, 1]} : vector<2x192xf32> to vector<1x192xf32>
    %cst_13 = arith.constant 9.99999974E-6 : f32
    %28 = vector.broadcast %cst_13 : f32 to vector<1x192xf32>
    %29 = arith.addf %25, %28 : vector<1x192xf32>
    %30 = math.rsqrt %29 : vector<1x192xf32>
    %31 = arith.mulf %27, %30 : vector<1x192xf32>
    %32 = vector.extract_strided_slice %26 {offsets = [1, 0], sizes = [1, 192], strides = [1, 1]} : vector<2x192xf32> to vector<1x192xf32>
    %33 = arith.mulf %20, %31 : vector<1x192xf32>
    %34 = arith.subf %32, %33 : vector<1x192xf32>
    %35 = vector.broadcast %31 : vector<1x192xf32> to vector<2x192xf32>
    %36 = arith.mulf %3, %35 : vector<2x192xf32>
    %37 = vector.broadcast %34 : vector<1x192xf32> to vector<2x192xf32>
    %38 = arith.addf %36, %37 : vector<2x192xf32>
    %cst_14 = arith.constant 0.000000e+00 : f32
    %39 = vector.broadcast %cst_14 : f32 to vector<2x192xf32>
    %40 = arith.cmpf oge, %38, %39 : vector<2x192xf32>
    %cst_15 = arith.constant 0.00999999977 : f32
    %41 = vector.broadcast %cst_15 : f32 to vector<2x192xf32>
    %42 = arith.mulf %41, %38 : vector<2x192xf32>
    %43 = arith.select %40, %38, %42 : vector<2x192xi1>, vector<2x192xf32>
    %44 = arith.truncf %43 : vector<2x192xf32> to vector<2x192xbf16>
    %c0_16 = arith.constant 0 : index
    %c0_17 = arith.constant 0 : index
    %45 = vector.load %arg5[%c0_16, %c0_17] : memref<192x96xbf16, #tpu.memory_space<vmem>>, vector<192x96xbf16>
    %cst_18 = arith.constant dense<0.000000e+00> : vector<2x96xf32>
    %46 = tpu.matmul %44, %45, %cst_18 {dimension_numbers = #tpu.dot_dimension_numbers<[1], [0], [0], [1], [0, 0, 1, 1], [], []>} : vector<2x192xbf16>, vector<192x96xbf16>, vector<2x96xf32> -> vector<2x96xf32>
    %cst_19 = arith.constant dense<0.000000e+00> : vector<96xf32>
    %47 = vector.multi_reduction <add>, %46, %cst_19 [0] : vector<2x96xf32> to vector<96xf32>
    %48 = vector.shape_cast %47 : vector<96xf32> to vector<1x96xf32>
    %49 = arith.mulf %46, %46 : vector<2x96xf32>
    %cst_20 = arith.constant dense<0.000000e+00> : vector<96xf32>
    %50 = vector.multi_reduction <add>, %49, %cst_20 [0] : vector<2x96xf32> to vector<96xf32>
    %51 = vector.shape_cast %50 : vector<96xf32> to vector<1x96xf32>
    %52 = tpu.concatenate %48, %51 in 0 : vector<1x96xf32>, vector<1x96xf32> -> vector<2x96xf32>
    %c0_21 = arith.constant 0 : index
    %c0_22 = arith.constant 0 : index
    %53 = vector.load %arg6[%c0_21, %c0_22] : memref<96x96xbf16, #tpu.memory_space<vmem>>, vector<96x96xbf16>
    %54 = arith.truncf %52 : vector<2x96xf32> to vector<2x96xbf16>
    %55 = arith.extf %54 : vector<2x96xbf16> to vector<2x96xf32>
    %56 = arith.subf %52, %55 : vector<2x96xf32>
    %57 = arith.truncf %56 : vector<2x96xf32> to vector<2x96xbf16>
    %cst_23 = arith.constant dense<0.000000e+00> : vector<2x96xf32>
    %58 = tpu.matmul %54, %53, %cst_23 {dimension_numbers = #tpu.dot_dimension_numbers<[1], [0], [0], [1], [0, 0, 1, 1], [], []>} : vector<2x96xbf16>, vector<96x96xbf16>, vector<2x96xf32> -> vector<2x96xf32>
    %cst_24 = arith.constant dense<0.000000e+00> : vector<2x96xf32>
    %59 = tpu.matmul %57, %53, %cst_24 {dimension_numbers = #tpu.dot_dimension_numbers<[1], [0], [0], [1], [0, 0, 1, 1], [], []>} : vector<2x96xbf16>, vector<96x96xbf16>, vector<2x96xf32> -> vector<2x96xf32>
    %60 = arith.addf %58, %59 : vector<2x96xf32>
    %61 = vector.extract_strided_slice %60 {offsets = [0, 0], sizes = [1, 96], strides = [1, 1]} : vector<2x96xf32> to vector<1x96xf32>
    %cst_25 = arith.constant 0.00520833349 : f32
    %62 = vector.broadcast %cst_25 : f32 to vector<1x96xf32>
    %63 = arith.mulf %61, %62 : vector<1x96xf32>
    %64 = vector.extract_strided_slice %60 {offsets = [1, 0], sizes = [1, 96], strides = [1, 1]} : vector<2x96xf32> to vector<1x96xf32>
    %cst_26 = arith.constant 0.00520833349 : f32
    %65 = vector.broadcast %cst_26 : f32 to vector<1x96xf32>
    %66 = arith.mulf %64, %65 : vector<1x96xf32>
    %67 = arith.mulf %63, %63 : vector<1x96xf32>
    %68 = arith.subf %66, %67 : vector<1x96xf32>
    %c0_27 = arith.constant 0 : index
    %c0_28 = arith.constant 0 : index
    %69 = vector.load %arg7[%c0_27, %c0_28] : memref<2x96xf32, #tpu.memory_space<vmem>>, vector<2x96xf32>
    %70 = vector.extract_strided_slice %69 {offsets = [0, 0], sizes = [1, 96], strides = [1, 1]} : vector<2x96xf32> to vector<1x96xf32>
    %cst_29 = arith.constant 9.99999974E-6 : f32
    %71 = vector.broadcast %cst_29 : f32 to vector<1x96xf32>
    %72 = arith.addf %68, %71 : vector<1x96xf32>
    %73 = math.rsqrt %72 : vector<1x96xf32>
    %74 = arith.mulf %70, %73 : vector<1x96xf32>
    %75 = vector.extract_strided_slice %69 {offsets = [1, 0], sizes = [1, 96], strides = [1, 1]} : vector<2x96xf32> to vector<1x96xf32>
    %76 = arith.mulf %63, %74 : vector<1x96xf32>
    %77 = arith.subf %75, %76 : vector<1x96xf32>
    %78 = vector.broadcast %74 : vector<1x96xf32> to vector<2x96xf32>
    %79 = arith.mulf %46, %78 : vector<2x96xf32>
    %80 = vector.broadcast %77 : vector<1x96xf32> to vector<2x96xf32>
    %81 = arith.addf %79, %80 : vector<2x96xf32>
    %c0_30 = arith.constant 0 : index
    %c0_31 = arith.constant 0 : index
    %82 = vector.load %arg9[%c0_30, %c0_31] : memref<1x96xf32, #tpu.memory_space<vmem>>, vector<1x96xf32>
    %cst_32 = arith.constant 5.000000e-01 : f32
    %83 = vector.broadcast %cst_32 : f32 to vector<1x96xf32>
    %84 = arith.cmpf ogt, %82, %83 : vector<1x96xf32>
    %cst_33 = arith.constant -1.000000e+30 : f32
    %85 = vector.shape_cast %84 : vector<1x96xi1> to vector<1x96xi1>
    %86 = vector.broadcast %85 : vector<1x96xi1> to vector<2x96xi1>
    %87 = vector.broadcast %cst_33 : f32 to vector<2x96xf32>
    %88 = arith.select %86, %87, %81 : vector<2x96xi1>, vector<2x96xf32>
    %cst_34 = arith.constant dense<0xFF800000> : vector<2xf32>
    %89 = vector.multi_reduction <maximumf>, %88, %cst_34 [1] : vector<2x96xf32> to vector<2xf32>
    %90 = vector.shape_cast %89 : vector<2xf32> to vector<2x1xf32>
    %91 = vector.broadcast %90 : vector<2x1xf32> to vector<2x96xf32>
    %92 = arith.subf %88, %91 : vector<2x96xf32>
    %93 = math.exp %92 : vector<2x96xf32>
    %cst_35 = arith.constant 0.000000e+00 : f32
    %94 = vector.shape_cast %84 : vector<1x96xi1> to vector<1x96xi1>
    %95 = vector.broadcast %94 : vector<1x96xi1> to vector<2x96xi1>
    %96 = vector.broadcast %cst_35 : f32 to vector<2x96xf32>
    %97 = arith.select %95, %96, %93 : vector<2x96xi1>, vector<2x96xf32>
    %c0_36 = arith.constant 0 : index
    %c0_37 = arith.constant 0 : index
    %98 = vector.load %arg8[%c0_36, %c0_37] : memref<96x96xbf16, #tpu.memory_space<vmem>>, vector<96x96xbf16>
    %99 = arith.truncf %97 : vector<2x96xf32> to vector<2x96xbf16>
    %100 = arith.extf %99 : vector<2x96xbf16> to vector<2x96xf32>
    %101 = arith.subf %97, %100 : vector<2x96xf32>
    %102 = arith.truncf %101 : vector<2x96xf32> to vector<2x96xbf16>
    %cst_38 = arith.constant dense<0.000000e+00> : vector<2x96xf32>
    %103 = tpu.matmul %99, %98, %cst_38 {dimension_numbers = #tpu.dot_dimension_numbers<[1], [0], [0], [1], [0, 0, 1, 1], [], []>} : vector<2x96xbf16>, vector<96x96xbf16>, vector<2x96xf32> -> vector<2x96xf32>
    %cst_39 = arith.constant dense<0.000000e+00> : vector<2x96xf32>
    %104 = tpu.matmul %102, %98, %cst_39 {dimension_numbers = #tpu.dot_dimension_numbers<[1], [0], [0], [1], [0, 0, 1, 1], [], []>} : vector<2x96xbf16>, vector<96x96xbf16>, vector<2x96xf32> -> vector<2x96xf32>
    %105 = arith.addf %103, %104 : vector<2x96xf32>
    %cst_40 = arith.constant 1.000000e-30 : f32
    %106 = vector.broadcast %cst_40 : f32 to vector<2x96xf32>
    %107 = arith.addf %105, %106 : vector<2x96xf32>
    %108 = math.log %107 : vector<2x96xf32>
    %109 = vector.broadcast %90 : vector<2x1xf32> to vector<2x96xf32>
    %110 = arith.addf %108, %109 : vector<2x96xf32>
    %111 = arith.subf %81, %110 : vector<2x96xf32>
    %cst_41 = arith.constant 0.000000e+00 : f32
    %112 = vector.broadcast %cst_41 : f32 to vector<2x96xf32>
    %113 = arith.minimumf %81, %112 : vector<2x96xf32>
    %114 = math.absf %81 : vector<2x96xf32>
    %cst_42 = arith.constant 0.000000e+00 : f32
    %115 = vector.broadcast %cst_42 : f32 to vector<2x96xf32>
    %116 = arith.subf %115, %114 : vector<2x96xf32>
    %117 = math.exp %116 : vector<2x96xf32>
    %cst_43 = arith.constant 1.000000e+00 : f32
    %118 = vector.broadcast %cst_43 : f32 to vector<2x96xf32>
    %119 = arith.addf %118, %117 : vector<2x96xf32>
    %120 = math.log %119 : vector<2x96xf32>
    %121 = arith.subf %113, %120 : vector<2x96xf32>
    %122 = vector.shape_cast %84 : vector<1x96xi1> to vector<1x96xi1>
    %123 = vector.broadcast %122 : vector<1x96xi1> to vector<2x96xi1>
    %124 = arith.select %123, %121, %111 : vector<2x96xi1>, vector<2x96xf32>
    %c0_44 = arith.constant 0 : index
    %c0_45 = arith.constant 0 : index
    %125 = vector.load %arg10[%c0_44, %c0_45] : memref<2x96xf32, #tpu.memory_space<vmem>>, vector<2x96xf32>
    tpu.vector_store %arg10[%c0_44, %c0_45], %124 {strides = array<i32>} : memref<2x96xf32, #tpu.memory_space<vmem>>, vector<2x96xf32>,
    return
  }
  func.func @transform_0(%arg0: i32) -> (i32, i32) {
    %c0_i32 = arith.constant 0 : i32
    %c0_i32_0 = arith.constant 0 : i32
    %c0_i32_1 = arith.constant 0 : i32
    return %c0_i32, %c0_i32_0 : i32, i32
  }
  func.func @transform_1(%arg0: i32) -> (i32, i32) {
    %c0_i32 = arith.constant 0 : i32
    %c0_i32_0 = arith.constant 0 : i32
    %c0_i32_1 = arith.constant 0 : i32
    return %c0_i32, %c0_i32_0 : i32, i32
  }
  func.func @transform_2(%arg0: i32) -> (i32, i32) {
    %c0_i32 = arith.constant 0 : i32
    %c0_i32_0 = arith.constant 0 : i32
    %c0_i32_1 = arith.constant 0 : i32
    return %c0_i32, %c0_i32_0 : i32, i32
  }
  func.func @transform_3(%arg0: i32) -> (i32, i32) {
    %c0_i32 = arith.constant 0 : i32
    %c0_i32_0 = arith.constant 0 : i32
    %c0_i32_1 = arith.constant 0 : i32
    return %c0_i32, %c0_i32_0 : i32, i32
  }
  func.func @transform_4(%arg0: i32) -> (i32, i32) {
    %c0_i32 = arith.constant 0 : i32
    %c0_i32_0 = arith.constant 0 : i32
    %c0_i32_1 = arith.constant 0 : i32
    return %c0_i32, %c0_i32_0 : i32, i32
  }
  func.func @transform_5(%arg0: i32) -> (i32, i32) {
    %c0_i32 = arith.constant 0 : i32
    %c0_i32_0 = arith.constant 0 : i32
    %c0_i32_1 = arith.constant 0 : i32
    return %c0_i32, %c0_i32_0 : i32, i32
  }
  func.func @transform_6(%arg0: i32) -> (i32, i32) {
    %c0_i32 = arith.constant 0 : i32
    %c0_i32_0 = arith.constant 0 : i32
    %c0_i32_1 = arith.constant 0 : i32
    return %c0_i32, %c0_i32_0 : i32, i32
  }
  func.func @transform_7(%arg0: i32) -> (i32, i32) {
    %c0_i32 = arith.constant 0 : i32
    %c0_i32_0 = arith.constant 0 : i32
    %c0_i32_1 = arith.constant 0 : i32
    return %c0_i32, %c0_i32_0 : i32, i32
  }
  func.func @transform_8(%arg0: i32) -> (i32, i32) {
    %c0_i32 = arith.constant 0 : i32
    %c0_i32_0 = arith.constant 0 : i32
    %c0_i32_1 = arith.constant 0 : i32
    return %c0_i32, %c0_i32_0 : i32, i32
  }
  func.func @transform_9(%arg0: i32) -> (i32, i32) {
    %c0_i32 = arith.constant 0 : i32
    %c0_i32_0 = arith.constant 0 : i32
    %c0_i32_1 = arith.constant 0 : i32
    return %c0_i32, %c0_i32_0 : i32, i32
  }
}

</mosaic_0001>

<bundles_post_ra>
// kernel: forward.1
= control target key start
LH: loop header
LB: loop body
LE: loop exit
PB: predicated region body
PF: predicated region fallthrough
CT: control target
= control target key end

     0   :  { %14 = vsyncpa [#allocation3], 0  ;;  %s1799_s0 = inlined_call_operand.vmem [shape: f32[2,96], index: 0, kind: input, shape index: {}]   ;;  %s1800_s1 = inlined_call_operand.hbm [shape: bf16[96,192], index: 1, kind: input, shape index: {}]   ;;  %s1801_s2 = inlined_call_operand.hbm [shape: bf16[192,192], index: 2, kind: input, shape index: {}]   ;;  %s1802_s3 = inlined_call_operand.vmem [shape: f32[2,192], index: 3, kind: input, shape index: {}]   ;;  %s1803_s4 = inlined_call_operand.hbm [shape: bf16[192,96], index: 4, kind: input, shape index: {}]   ;;  %s1804_s5 = inlined_call_operand.vmem [shape: bf16[96,96], index: 5, kind: input, shape index: {}]   ;;  %s1805_s6 = inlined_call_operand.vmem [shape: f32[2,96], index: 6, kind: input, shape index: {}]   ;;  %s1806_s7 = inlined_call_operand.hbm [shape: bf16[96,96], index: 7, kind: input, shape index: {}]   ;;  %s1807_s8 = inlined_call_operand.vmem [shape: f32[1,96], index: 8, kind: input, shape index: {}]   ;;  %s1808_s9 = inlined_call_operand.vmem [shape: f32[2,96], index: 9, kind: output, shape index: {}]  }
   0x1   :  { %15 = vsyncpa [#allocation5], 0 }
   0x2   :  { %16 = vsyncpa [#allocation8], 0  ;;  %s1445_s30 = smov [#allocation4]   ;;  %s1446_s11 = smov [#allocation2]  }
   0x3   :  { %s36_s10 = sshll.u32 %s1445_s30, 4  ;;  %s24_s12 = sshll.u32 %s1446_s11, 4  ;;  %s37_s10 = int_to_ptr.vmem [resolvable:$true] %s36_s10  ;;  %s1507_s12 = int_to_ptr.vmem [resolvable:$true] %s24_s12 }
   0x4   :  { %s1351_s15 = scalar_lea.hbm %s1801_s2, 3072 }
   0x5   :  { %p1352_p0 = scmp.ne.s32.totalorder %s1801_s2, %s1351_s15  ;;  %p1355_p1 = scmp.lt.u32.totalorder %s1351_s15, %s1801_s2 }
   0x7   :  { %p1357_p2 = pnand %p1355_p1, %p1352_p0 }
   0x9   :  { %1360 = shalt.err (!%p1357_p2)
}
   0xa   :  { %s1361_s20 = scalar_lea.vmem %s37_s10, 3072  ;;  %p1366_p4 = scmp.lt.s32.totalorder %s37_s10, %s37_s10 }
   0xb   :  { %p1362_p3 = scmp.ne.s32.totalorder %s37_s10, %s1361_s20  ;;  %p1367_p5 = scmp.lt.s32.totalorder %s1361_s20, %s1361_s20 }
   0xd   :  { %p1368_p6 = por %p1367_p5, %p1366_p4 }
   0xf   :  { %p1369_p7 = pnand %p1368_p6, %p1362_p3 }
  0x11   :  { %1372 = shalt.err (!%p1369_p7)
}
  0x12   :  { %s1447_s21 = smov 128   ;;  %s1448_s22 = smov 8  }
  0x13   :  { %42 = dma.hbm_to_vmem [thread:$0]  %s1801_s2, 3072, %s37_s10, [#allocation5], %s1447_s21, %s1447_s21, %s1448_s22  }
  0x14   :  { %s1373_s27 = scalar_lea.hbm %s1800_s1, 1536 }
  0x15   :  { %p1374_p8 = scmp.ne.s32.totalorder %s1800_s1, %s1373_s27  ;;  %p1377_p9 = scmp.lt.u32.totalorder %s1373_s27, %s1800_s1 }
  0x17   :  { %p1379_p10 = pnand %p1377_p9, %p1374_p8 }
  0x19   :  { %1382 = shalt.err (!%p1379_p10)
}
  0x1a   :  { %s1383_s13 = scalar_lea.vmem %s1507_s12, 1536  ;;  %p1388_p12 = scmp.lt.s32.totalorder %s1507_s12, %s1507_s12 }
  0x1b   :  { %p1384_p11 = scmp.ne.s32.totalorder %s1507_s12, %s1383_s13  ;;  %p1389_p13 = scmp.lt.s32.totalorder %s1383_s13, %s1383_s13 }
  0x1d   :  { %p1390_p0 = por %p1389_p13, %p1388_p12 }
  0x1f   :  { %p1391_p1 = pnand %p1390_p0, %p1384_p11 }
  0x21   :  { %1394 = shalt.err (!%p1391_p1)
}
  0x22   :  { %30 = dma.hbm_to_vmem [thread:$0]  %s1800_s1, 1536, %s1507_s12, [#allocation3], %s1447_s21, %s1447_s21, %s1448_s22  }
  0x23   :  { %s1449_s14 = smov [#allocation6]   ;;  %s1395_s18 = scalar_lea.hbm %s1803_s4, 1536 }
  0x24   :  { %s50_s15 = sshll.u32 %s1449_s14, 4  ;;  %p1396_p2 = scmp.ne.s32.totalorder %s1803_s4, %s1395_s18  ;;  %s51_s15 = int_to_ptr.vmem [resolvable:$true] %s50_s15 }
  0x25   :  { %p1399_p3 = scmp.lt.u32.totalorder %s1395_s18, %s1803_s4 }
  0x27   :  { %p1401_p4 = pnand %p1399_p3, %p1396_p2 }
  0x29   :  { %1404 = shalt.err (!%p1401_p4)
}
  0x2a   :  { %s1405_s25 = scalar_lea.vmem %s51_s15, 1536  ;;  %p1410_p6 = scmp.lt.s32.totalorder %s51_s15, %s51_s15 }
  0x2b   :  { %p1406_p5 = scmp.ne.s32.totalorder %s51_s15, %s1405_s25  ;;  %p1411_p7 = scmp.lt.s32.totalorder %s1405_s25, %s1405_s25 }
  0x2d   :  { %p1412_p8 = por %p1411_p7, %p1410_p6 }
  0x2f   :  { %p1413_p9 = pnand %p1412_p8, %p1406_p5 }
  0x31   :  { %1416 = shalt.err (!%p1413_p9)
}
  0x32   :  { %s1450_s1 = smov 64   ;;  %s1451_s12 = smov 4  }
  0x33   :  { %56 = dma.hbm_to_vmem [thread:$0]  %s1803_s4, 1536, %s51_s15, [#allocation5], %s1450_s1, %s1450_s1, %s1451_s12  }
  0x34   :  { %s1452_s26 = smov [#allocation7]   ;;  %s1417_s30 = scalar_lea.hbm %s1806_s7, 768 }
  0x35   :  { %s66_s27 = sshll.u32 %s1452_s26, 4  ;;  %p1418_p10 = scmp.ne.s32.totalorder %s1806_s7, %s1417_s30  ;;  %s67_s27 = int_to_ptr.vmem [resolvable:$true] %s66_s27 }
  0x36   :  { %p1421_p11 = scmp.lt.u32.totalorder %s1417_s30, %s1806_s7 }
  0x38   :  { %p1423_p12 = pnand %p1421_p11, %p1418_p10 }
  0x3a   :  { %1426 = shalt.err (!%p1423_p12)
}
  0x3b   :  { %s1427_s14 = scalar_lea.vmem %s67_s27, 768  ;;  %p1432_p0 = scmp.lt.s32.totalorder %s67_s27, %s67_s27 }
  0x3c   :  { %p1428_p13 = scmp.ne.s32.totalorder %s67_s27, %s1427_s14  ;;  %p1433_p1 = scmp.lt.s32.totalorder %s1427_s14, %s1427_s14 }
  0x3e   :  { %p1434_p2 = por %p1433_p1, %p1432_p0 }
  0x40   :  { %p1435_p3 = pnand %p1434_p2, %p1428_p13 }
  0x42   :  { %1438 = shalt.err (!%p1435_p3)
}
  0x43   :  { %72 = dma.hbm_to_vmem [thread:$0]  %s1806_s7, 768, %s67_s27, [#allocation8], %s1450_s1, %s1450_s1, %s1451_s12  }
  0x44   :  { %1439 = dma.done.wait [#allocation3], 1536  }
  0x45   :  { %1440 = vsyncadd [#allocation3], 4294965760 }
  0x46   :  { %1441 = dma.done.wait [#allocation5], 4608  }
  0x47   :  { %1442 = vsyncadd [#allocation5], 4294962688 }
  0x48   :  { %1443 = dma.done.wait [#allocation8], 768  }
  0x49   :  { %1444 = vsyncadd [#allocation8], 4294966528  ;;  %v1453_v0 = vmov 0   ;;  %v1259_v1 = vld [vmem:[#allocation2 + $0x4] ss:$8 sps:$4 sm:$0xff]   ;;  %vm162_vm0 = vcmask 785408  }
  0x4a   :  { %198 = vmatprep.mubr.bf16.mxu0 %v1453_v0  ;;  %v1261_v2 = vld [vmem:[#allocation2] ss:$8 sps:$4 sm:$0xff]   ;;  %166 = vmatprep.subr.bf16.mxu0 %v1259_v1  ;;  %v1262_v3 = vld [vmem:[#allocation2 + $0x14] ss:$8 sps:$4 sm:$0xff]   ;;  %v1264_v4 = vld [vmem:[#allocation2 + $0x10] ss:$8 sps:$4 sm:$0xff]  }
  0x4b   :  { %167 = vmatpush1.bf16.msra.mxu0 %v1261_v2  ;;  %v1265_v5 = vld [vmem:[#allocation2 + $0x24] ss:$8 sps:$4 sm:$0xff]   ;;  %v1267_v6 = vld [vmem:[#allocation2 + $0x20] ss:$8 sps:$4 sm:$0xff]   ;;  %v1268_v7 = vld [vmem:[#allocation2 + $0x34] ss:$8 sps:$4 sm:$0xff]  }
  0x4c   :  { %168 = vmatprep.subr.bf16.mxu0 %v1262_v3  ;;  %v1563_v8 = vld [vmem:[#allocation4 + $0x4] ss:$8 sps:$4 sm:$0xff]   ;;  %v1565_v9 = vld [vmem:[#allocation4] ss:$8 sps:$4 sm:$0xff]   ;;  %v1270_v10 = vld [vmem:[#allocation2 + $0x30] ss:$8 sps:$4 sm:$0xff]  }
  0x4d   :  { %v1567_v11 = vld [vmem:[#allocation4 + $0x14] ss:$8 sps:$4 sm:$0xff]   ;;  %v1271_v12 = vld [vmem:[#allocation2 + $0x44] ss:$8 sps:$4 sm:$0xff]   ;;  %398 = vmatprep.subr.bf16.mxu1 %v1563_v8  ;;  %v1571_v13 = vld [vmem:[#allocation4 + $0x10] ss:$8 sps:$4 sm:$0xff]  }
  0x4e   :  { %399 = vmatpush1.bf16.msra.mxu1 %v1565_v9  ;;  %v1574_v14 = vld [vmem:[#allocation4 + $0x24] ss:$8 sps:$4 sm:$0xff]   ;;  %v1273_v15 = vld [vmem:[#allocation2 + $0x40] ss:$8 sps:$4 sm:$0xff]   ;;  %v1274_v16 = vld [vmem:[#allocation2 + $0x54] ss:$8 sps:$4 sm:$0xff]  }
  0x4f   :  { %169 = vmatpush1.bf16.msra.mxu0 %v1264_v4  ;;  %400 = vmatprep.subr.bf16.mxu1 %v1567_v11  ;;  %v1576_v17 = vld [vmem:[#allocation4 + $0x20] ss:$8 sps:$4 sm:$0xff]   ;;  %v1579_v18 = vld [vmem:[#allocation4 + $0x34] ss:$8 sps:$4 sm:$0xff]   ;;  %v1276_v19 = vld [vmem:[#allocation2 + $0x50] ss:$8 sps:$4 sm:$0xff]  }
  0x50   :  { %170 = vmatprep.subr.bf16.mxu0 %v1265_v5  ;;  %v88_v20 = vld [vmem:[%s1799_s0] sm:$0x3]  ;;  %v1585_v21 = vld [vmem:[#allocation4 + $0x30] ss:$8 sps:$4 sm:$0xff]   ;;  %v1587_v22 = vld [vmem:[#allocation4 + $0x44] ss:$8 sps:$4 sm:$0xff]  }
  0x51   :  { %v89_v23 = vpack.c.bf16 %v88_v20, %v88_v20  ;;  %v1591_v24 = vld [vmem:[#allocation4 + $0x40] ss:$8 sps:$4 sm:$0xff]   ;;  %v1593_v25 = vld [vmem:[#allocation4 + $0x54] ss:$8 sps:$4 sm:$0xff]   ;;  %v1599_v26 = vld [vmem:[#allocation4 + $0x50] ss:$8 sps:$4 sm:$0xff]  }
  0x52   :  { %401 = vmatpush1.bf16.msra.mxu1 %v1571_v13  ;;  %v1604_v27 = vld [vmem:[#allocation4 + $0x64] ss:$8 sps:$4 sm:$0xff]   ;;  %v1606_v28 = vld [vmem:[#allocation4 + $0x60] ss:$8 sps:$4 sm:$0xff]   ;;  %v1610_v29 = vld [vmem:[#allocation4 + $0x74] ss:$8 sps:$4 sm:$0xff]  }
  0x53   :  { %171 = vmatpush1.bf16.msra.mxu0 %v1267_v6  ;;  %402 = vmatprep.subr.bf16.mxu1 %v1574_v14  ;;  %v1612_v30 = vld [vmem:[#allocation4 + $0x70] ss:$8 sps:$4 sm:$0xff]   ;;  %v1616_v31 = vld [vmem:[#allocation4 + $0x84] ss:$8 sps:$4 sm:$0xff]   ;;  %v1618_v32 = vld [vmem:[#allocation4 + $0x80] ss:$8 sps:$4 sm:$0xff]  }
  0x54   :  { %172 = vmatprep.subr.bf16.mxu0 %v1268_v7  ;;  %v1622_v33 = vld [vmem:[#allocation4 + $0x94] ss:$8 sps:$4 sm:$0xff]   ;;  %v1624_v34 = vld [vmem:[#allocation4 + $0x90] ss:$8 sps:$4 sm:$0xff]   ;;  %v1626_v35 = vld [vmem:[#allocation4 + $0xa4] ss:$8 sps:$4 sm:$0xff]  }
  0x55   :  { %v1630_v36 = vld [vmem:[#allocation4 + $0xa0] ss:$8 sps:$4 sm:$0xff]   ;;  %v1633_v37 = vld [vmem:[#allocation4 + $0xb4] ss:$8 sps:$4 sm:$0xff]   ;;  %v1636_v38 = vld [vmem:[#allocation4 + $0xb0] ss:$8 sps:$4 sm:$0xff]  }
  0x56   :  { %403 = vmatpush1.bf16.msra.mxu1 %v1576_v17  ;;  %vm207_vm1 = vcmask 1041408   ;;  %vm215_vm2 = vcmask 517120   ;;  %vm239_vm3 = vcmask 1040384   ;;  %vm394_vm4 = vcmask 523264  }
  0x57   :  { %173 = vmatpush1.bf16.msra.mxu0 %v1270_v10  ;;  %404 = vmatprep.subr.bf16.mxu1 %v1579_v18  ;;  %vm1456_vm7 = vmmov 0   ;;  %vm718_vm8 = vcmask 779264  }
  0x58   :  { %174 = vmatprep.subr.bf16.mxu0 %v1271_v12 }
  0x5a   :  { %405 = vmatpush1.bf16.msra.mxu1 %v1585_v21 }
  0x5b   :  { %175 = vmatpush1.bf16.msra.mxu0 %v1273_v15  ;;  %406 = vmatprep.subr.bf16.mxu1 %v1587_v22 }
  0x5c   :  { %176 = vmatprep.subr.bf16.mxu0 %v1274_v16 }
  0x5e   :  { %407 = vmatpush1.bf16.msra.mxu1 %v1591_v24 }
  0x5f   :  { %177 = vmatpush1.bf16.msra.mxu0 %v1276_v19  ;;  %408 = vmatprep.subr.bf16.mxu1 %v1593_v25 }
  0x60   :  { %678 = vmatprep.subr.bf16.mxu0 %v1453_v0 }
  0x62   :  { %1090 = vmatmul.mubr.msk.bf16.vlgmr.msra.gmra.mrb[0].mxu0 %vm162_vm0, %v89_v23  ;;  %409 = vmatpush1.bf16.msra.mxu1 %v1599_v26 }
  0x63   :  { %410 = vmatprep.subr.bf16.mxu1 %v1604_v27 }
  0x66   :  { %411 = vmatpush1.bf16.msra.mxu1 %v1606_v28 }
  0x67   :  { %412 = vmatprep.subr.bf16.mxu1 %v1610_v29 }
  0x6a   :  { %413 = vmatpush1.bf16.msra.mxu1 %v1612_v30 }
  0x6b   :  { %414 = vmatprep.subr.bf16.mxu1 %v1616_v31 }
  0x6e   :  { %415 = vmatpush1.bf16.msra.mxu1 %v1618_v32 }
  0x6f   :  { %416 = vmatprep.subr.bf16.mxu1 %v1622_v33 }
  0x72   :  { %417 = vmatpush1.bf16.msra.mxu1 %v1624_v34 }
  0x73   :  { %418 = vmatprep.subr.bf16.mxu1 %v1626_v35 }
  0x76   :  { %419 = vmatpush1.bf16.msra.mxu1 %v1630_v36 }
  0x77   :  { %420 = vmatprep.subr.bf16.mxu1 %v1633_v37 }
  0x7a   :  { %421 = vmatpush1.bf16.msra.mxu1 %v1636_v38 }
  0x7b   :  { %442 = vmatprep.subr.bf16.mxu1 %v1563_v8 }
 0x135   :  { %v1641_v39 = vpop.f32.mrb[0].mxu0 }
 0x136   :  { %v208_v40 = vsel %vm207_vm1, %v1641_v39, 0.0  ;;  %v223_v41 = vmul.f32 %v1641_v39, %v1641_v39  ;;  %v1646_v42 = vpop.f32.mrb[1].mxu0 }
 0x137   :  { %v209_v43 = vrot.slane %v208_v40, 4  ;;  %v216_v44 = vsel %vm215_vm2, %v1646_v42, 0.0  ;;  %v224_v45 = vmul.f32 %v1646_v42, %v1646_v42  ;;  %v204_v46 = vpop.f32.mrb[2].mxu0 }
 0x138   :  { %v225_v47 = vsel %vm207_vm1, %v223_v41, 0.0  ;;  %v217_v48 = vrot.slane %v216_v44, 4  ;;  %v205_v49 = vpop.f32.mrb[3].mxu0 }
 0x139   :  { %v210_v50 = vadd.f32 %v209_v43, %v208_v40  ;;  %v226_v51 = vrot.slane %v225_v47, 4  ;;  %v232_v52 = vsel %vm215_vm2, %v224_v45, 0.0 }
 0x13a   :  { %v218_v53 = vadd.f32 %v217_v48, %v216_v44  ;;  %v233_v54 = vrot.slane %v232_v52, 4  ;;  %v1454_v48 = vmov 1983009808  }
 0x13b   :  { %v211_v55 = vrot.slane %v210_v50, 2  ;;  %v227_v56 = vadd.f32 %v226_v51, %v225_v47  ;;  %v504_v49 = vunpack.c.l.s4 %v1454_v48 }
 0x13c   :  { %v219_v57 = vrot.slane %v218_v53, 2  ;;  %v234_v58 = vadd.f32 %v233_v54, %v232_v52 }
 0x13d   :  { %v212_v59 = vadd.f32 %v211_v55, %v210_v50  ;;  %v228_v60 = vrot.slane %v227_v56, 2  ;;  %v506_v50 = vlaneseq  ;;  %v505_v51 = vunpack.c.0.s8 %v504_v49 }
 0x13e   :  { %v220_v61 = vadd.f32 %v219_v57, %v218_v53  ;;  %v235_v62 = vrot.slane %v234_v58, 2 }
 0x13f   :  { %v213_v63 = vrot.slane %v212_v59, 1  ;;  %v229_v1 = vadd.f32 %v228_v60, %v227_v56  ;;  %v507_v52 = vshrl.u32 %v506_v50, 7 }
 0x140   :  { %v221_v2 = vrot.slane %v220_v61, 1  ;;  %v236_v3 = vadd.f32 %v235_v62, %v234_v58  ;;  %v495_v58 = vld [vmem:[%s1802_s3] sm:$0xf] }
 0x141   :  { %v230_v4 = vrot.slane %v229_v1, 1  ;;  %v214_v6 = vadd.f32 %v213_v63, %v212_v59  ;;  %v508_v54 = vsub.s32 %v505_v51, %v507_v52  ;;  %v1692_v60 = vsub.s32 0, %v507_v52 }
 0x142   :  { %v237_v5 = vrot.slane %v236_v3, 1  ;;  %v222_v8 = vadd.f32 %v221_v2, %v220_v61  ;;  %v521_v61 = vsub.s32 2, %v507_v52 }
 0x143   :  { %v231_v7 = vadd.f32 %v230_v4, %v229_v1 }
 0x144   :  { %v238_v10 = vadd.f32 %v237_v5, %v236_v3 }
 0x145   :  { %v240_v12 = vsel %vm239_vm3, %v214_v6, %v231_v7 }
 0x146   :  { %v241_v15 = vsel %vm239_vm3, %v222_v8, %v238_v10  ;;  %v266_v16 = vpack.c.bf16 %v240_v12, %v240_v12 }
 0x147   :  { %v267_v19 = vpack.c.bf16 %v241_v15, %v241_v15 }
 0x148   :  { %v268_v20 = vunpack.c.l.bf16 %v266_v16 }
 0x149   :  { %v269_v23 = vunpack.c.l.bf16 %v267_v19 }
 0x14a   :  { %v270_v40 = vsub.f32 %v240_v12, %v268_v20 }
 0x14b   :  { %v271_v41 = vsub.f32 %v241_v15, %v269_v23  ;;  %v1699_v15 = vsub.s32 1, %v507_v52 }
 0x14c   :  { %v272_v44 = vpack.c.bf16 %v270_v40, %v270_v40 }
 0x14d   :  { %v273_v43 = vpack.c.bf16 %v271_v41, %v271_v41 }
 0x14f   :  { %1115 = vmatprep.mubr.msk.bf16.mxu1 %vm394_vm4, %v273_v43 }
 0x150   :  { %431 = vmatmul.mubr.bf16.vlgmr.msra.gmra.mrb[0].mxu1 %v272_v44 }
 0x151   :  { %443 = vmatpush1.bf16.msra.mxu1 %v1565_v9  ;;  %1116 = vmatprep.mubr.msk.bf16.mxu1 %vm394_vm4, %v267_v19  ;;  %v1313_v9 = vld [vmem:[#allocation6] sm:$0xff]  }
 0x152   :  { %444 = vmatprep.subr.bf16.mxu1 %v1567_v11  ;;  %679 = vmatpush1.bf16.msra.mxu0 %v1313_v9  ;;  %v1314_v11 = vld [vmem:[#allocation6 + $0x8] sm:$0xff]  }
 0x153   :  { %680 = vmatprep.subr.bf16.mxu0 %v1453_v0 }
 0x155   :  { %445 = vmatpush1.bf16.msra.mxu1 %v1571_v13  ;;  %v1315_v13 = vld [vmem:[#allocation6 + $0x10] sm:$0xff]  }
 0x156   :  { %446 = vmatprep.subr.bf16.mxu1 %v1574_v14  ;;  %681 = vmatpush1.bf16.msra.mxu0 %v1314_v11  ;;  %v1316_v14 = vld [vmem:[#allocation6 + $0x18] sm:$0xff]  }
 0x157   :  { %682 = vmatprep.subr.bf16.mxu0 %v1453_v0 }
 0x159   :  { %447 = vmatpush1.bf16.msra.mxu1 %v1576_v17  ;;  %v1317_v17 = vld [vmem:[#allocation6 + $0x20] sm:$0xff]  }
 0x15a   :  { %448 = vmatprep.subr.bf16.mxu1 %v1579_v18  ;;  %683 = vmatpush1.bf16.msra.mxu0 %v1315_v13  ;;  %v1318_v18 = vld [vmem:[#allocation6 + $0x28] sm:$0xff]  }
 0x15b   :  { %684 = vmatprep.subr.bf16.mxu0 %v1453_v0 }
 0x15d   :  { %449 = vmatpush1.bf16.msra.mxu1 %v1585_v21  ;;  %v1319_v21 = vld [vmem:[#allocation6 + $0x30] sm:$0xff]  }
 0x15e   :  { %450 = vmatprep.subr.bf16.mxu1 %v1587_v22  ;;  %685 = vmatpush1.bf16.msra.mxu0 %v1316_v14  ;;  %v1320_v22 = vld [vmem:[#allocation6 + $0x38] sm:$0xff]  }
 0x15f   :  { %686 = vmatprep.subr.bf16.mxu0 %v1453_v0 }
 0x161   :  { %451 = vmatpush1.bf16.msra.mxu1 %v1591_v24  ;;  %v1321_v24 = vld [vmem:[#allocation6 + $0x40] sm:$0xff]  }
 0x162   :  { %452 = vmatprep.subr.bf16.mxu1 %v1593_v25  ;;  %687 = vmatpush1.bf16.msra.mxu0 %v1317_v17  ;;  %v1322_v25 = vld [vmem:[#allocation6 + $0x48] sm:$0xff]   ;;  %v1325_v17 = vld [vmem:[%s1804_s5] sm:$0xff]  }
 0x163   :  { %688 = vmatprep.subr.bf16.mxu0 %v1453_v0 }
 0x165   :  { %453 = vmatpush1.bf16.msra.mxu1 %v1599_v26  ;;  %v1323_v26 = vld [vmem:[#allocation6 + $0x50] sm:$0xff]  }
 0x166   :  { %454 = vmatprep.subr.bf16.mxu1 %v1604_v27  ;;  %689 = vmatpush1.bf16.msra.mxu0 %v1318_v18  ;;  %v1324_v27 = vld [vmem:[#allocation6 + $0x58] sm:$0xff]   ;;  %v1455_v18 = vmov 0.0  }
 0x167   :  { %690 = vmatprep.subr.bf16.mxu0 %v1453_v0 }
 0x169   :  { %455 = vmatpush1.bf16.msra.mxu1 %v1606_v28 }
 0x16a   :  { %456 = vmatprep.subr.bf16.mxu1 %v1610_v29  ;;  %691 = vmatpush1.bf16.msra.mxu0 %v1319_v21  ;;  %v1326_v21 = vld [vmem:[%s1804_s5 + $0x8] sm:$0xff]  }
 0x16b   :  { %692 = vmatprep.subr.bf16.mxu0 %v1453_v0 }
 0x16d   :  { %457 = vmatpush1.bf16.msra.mxu1 %v1612_v30 }
 0x16e   :  { %458 = vmatprep.subr.bf16.mxu1 %v1616_v31  ;;  %693 = vmatpush1.bf16.msra.mxu0 %v1320_v22  ;;  %v1327_v22 = vld [vmem:[%s1804_s5 + $0x10] sm:$0xff]  }
 0x16f   :  { %694 = vmatprep.subr.bf16.mxu0 %v1453_v0 }
 0x171   :  { %459 = vmatpush1.bf16.msra.mxu1 %v1618_v32 }
 0x172   :  { %460 = vmatprep.subr.bf16.mxu1 %v1622_v33  ;;  %695 = vmatpush1.bf16.msra.mxu0 %v1321_v24  ;;  %v1328_v24 = vld [vmem:[%s1804_s5 + $0x18] sm:$0xff]  }
 0x173   :  { %696 = vmatprep.subr.bf16.mxu0 %v1453_v0 }
 0x175   :  { %461 = vmatpush1.bf16.msra.mxu1 %v1624_v34 }
 0x176   :  { %462 = vmatprep.subr.bf16.mxu1 %v1626_v35  ;;  %697 = vmatpush1.bf16.msra.mxu0 %v1322_v25  ;;  %v1329_v25 = vld [vmem:[%s1804_s5 + $0x20] sm:$0xff]  }
 0x177   :  { %698 = vmatprep.subr.bf16.mxu0 %v1453_v0 }
 0x179   :  { %463 = vmatpush1.bf16.msra.mxu1 %v1630_v36 }
 0x17a   :  { %464 = vmatprep.subr.bf16.mxu1 %v1633_v37  ;;  %699 = vmatpush1.bf16.msra.mxu0 %v1323_v26  ;;  %v1330_v26 = vld [vmem:[%s1804_s5 + $0x28] sm:$0xff]  }
 0x17b   :  { %700 = vmatprep.subr.bf16.mxu0 %v1453_v0 }
 0x17d   :  { %465 = vmatpush1.bf16.msra.mxu1 %v1636_v38 }
 0x17e   :  { %701 = vmatpush1.bf16.msra.mxu0 %v1324_v27  ;;  %1207 = vmatprep.subr.bf16.mxu1 %v1455_v18 }
 0x17f   :  { %1175 = vmatprep.subr.bf16.mxu0 %v1455_v18 }
 0x180   :  { %475 = vmatmul.mubr.bf16.vlgmr.msra.gmra.mrb[0].mxu1 %v266_v16  ;;  %v557_v16 = vsub.s32 3, %v507_v52 }
 0x181   :  { %1219 = vmatprep.mubr.msk.bf16.mxu1 %vm1456_vm7, %v1455_v18 }
 0x253   :  { %v476_v28 = vpop.f32.mrb[0].mxu1 }
 0x254   :  { %v483_v29 = vmul.f32 0.020833334, %v476_v28  ;;  %v478_v30 = vpop.f32.mrb[1].mxu1 }
 0x255   :  { %v484_v31 = vmul.f32 0.020833334, %v478_v30  ;;  %v480_v32 = vpop.f32.mrb[2].mxu1 }
 0x256   :  { %v485_v33 = vmul.f32 %v483_v29, %v483_v29  ;;  %v481_v34 = vpop.f32.mrb[3].mxu1 }
 0x257   :  { %v486_v35 = vmul.f32 %v484_v31, %v484_v31 }
 0x258   :  { %v489_v36 = vrot.slane %v485_v33, 7 }
 0x259   :  { %v490_v37 = vrot.slane %v486_v35, 7 }
 0x25a   :  { %v493_v38 = vsub.f32 %v483_v29, %v489_v36 }
 0x25b   :  { %v494_v45 = vsub.f32 %v484_v31, %v490_v37 }
 0x25c   :  { %v496_v46 = vadd.f32 1e-05, %v493_v38 }
 0x25d   :  { %v497_v47 = vadd.f32 1e-05, %v494_v45 }
 0x25e   :  { %1337 = vrsqrt.f32 %v496_v46 }
 0x25f   :  { %1339 = vrsqrt.f32 %v497_v47 }
 0x268   :  { %v1338_v53 = vpop.eup %1337 }
 0x269   :  { %v1340_v55 = vpop.eup %1339 }
 0x26a   :  { %v502_v56 = vcombine.low %v1338_v53, %v1340_v55 }
 0x26c   :  { %v509_v57 = vrot.slane %v502_v56, %v508_v54 }
 0x26e   :  { %v1117_v59 = vrot.slane %v509_v57, 9  ;;  %v1331_v57 = vld [vmem:[#allocation7] sm:$0xff]  }
 0x26f   :  { %1208 = vmatpush3.bf16.msra.mxu1 %v1331_v57 }
 0x270   :  { %v513_v62 = vmul.f32 %v1117_v59, %v495_v58  ;;  %1209 = vmatprep.subr.bf16.mxu1 %v1455_v18 }
 0x272   :  { %v518_v63 = vrot.slane %v513_v62, %v1692_v60  ;;  %v522_v1 = vrot.slane %v513_v62, %v521_v61 }
 0x274   :  { %v525_v2 = vmul.f32 %v518_v63, %v483_v29  ;;  %v526_v3 = vmul.f32 %v522_v1, %v484_v31  ;;  %v543_v4 = vrot.slane %v518_v63, %v1692_v60  ;;  %v547_v5 = vrot.slane %v522_v1, %v1692_v60 }
 0x276   :  { %v529_v6 = vcombine.low %v525_v2, %v526_v3  ;;  %v549_v7 = vmul.f32 %v547_v5, %v1646_v42  ;;  %v548_v8 = vmul.f32 %v543_v4, %v1641_v39  ;;  %v901_v5 = vld [vmem:[%s1807_s8] sm:$0x1] }
 0x277   :  { %vm902_vm9 = vcmp.gt.f32.partialorder %v901_v5, 0.5 }
 0x278   :  { %v536_v10 = vrot.slane %v529_v6, %v508_v54 }
 0x27a   :  { %v537_v12 = vrot.slane %v536_v10, 7 }
 0x27c   :  { %v539_v19 = vsub.f32 %v495_v58, %v537_v12 }
 0x27e   :  { %v554_v20 = vrot.slane %v539_v19, %v1699_v15  ;;  %v558_v23 = vrot.slane %v539_v19, %v557_v16  ;;  %v903_v19 = vsel %vm902_vm9, 1, %v1453_v0 }
 0x280   :  { %v568_v40 = vrot.slane %v558_v23, %v1699_v15  ;;  %v564_v41 = vrot.slane %v554_v20, %v1699_v15 }
 0x282   :  { %v570_v43 = vadd.f32 %v568_v40, %v549_v7  ;;  %v569_v44 = vadd.f32 %v564_v41, %v548_v8  ;;  %v879_v7 = vld [vmem:[%s1805_s6] sm:$0x3]  ;;  %v907_v40 = vrot.slane %v903_v19, %v1692_v60 }
 0x284   :  { %vm572_vm5 = vcmp.ge.f32.partialorder %v570_v43, 0.0  ;;  %v574_v9 = vmul.f32 0.01, %v570_v43  ;;  %vm571_vm6 = vcmp.ge.f32.partialorder %v569_v44, 0.0  ;;  %v573_v42 = vmul.f32 0.01, %v569_v44 }
 0x285   :  { %vm1768_vm10 = vcmp.eq.s32.totalorder %v907_v40, 1 }
 0x286   :  { %v576_v39 = vsel %vm572_vm5, %v570_v43, %v574_v9  ;;  %v575_v11 = vsel %vm571_vm6, %v569_v44, %v573_v42 }
 0x287   :  { %v578_v13 = vpack.c.bf16 %v576_v39, %v576_v39  ;;  %v577_v14 = vpack.c.bf16 %v575_v11, %v575_v11  ;;  %v1332_v39 = vld [vmem:[#allocation7 + $0x8] sm:$0xff]   ;;  %v1335_v11 = vld [vmem:[#allocation7 + $0x20] sm:$0xff]  }
 0x288   :  { %1210 = vmatpush3.bf16.msra.mxu1 %v1332_v39 }
 0x289   :  { %1130 = vmatprep.mubr.msk.bf16.mxu0 %vm394_vm4, %v578_v13  ;;  %1211 = vmatprep.subr.bf16.mxu1 %v1455_v18  ;;  %v1336_v13 = vld [vmem:[#allocation7 + $0x28] sm:$0xff]  }
 0x28a   :  { %711 = vmatmul.mubr.bf16.vlgmr.msra.gmra.mrb[4].mxu0 %v577_v14 }
 0x28b   :  { %1176 = vmatpush3.bf16.msra.mxu0 %v1325_v17  ;;  %1187 = vmatprep.mubr.msk.bf16.mxu0 %vm1456_vm7, %v1455_v18 }
 0x28c   :  { %1177 = vmatprep.subr.bf16.mxu0 %v1455_v18 }
 0x28f   :  { %1178 = vmatpush3.bf16.msra.mxu0 %v1326_v21 }
 0x290   :  { %1179 = vmatprep.subr.bf16.mxu0 %v1455_v18 }
 0x293   :  { %1180 = vmatpush3.bf16.msra.mxu0 %v1327_v22 }
 0x294   :  { %1181 = vmatprep.subr.bf16.mxu0 %v1455_v18 }
 0x297   :  { %1182 = vmatpush3.bf16.msra.mxu0 %v1328_v24 }
 0x298   :  { %1183 = vmatprep.subr.bf16.mxu0 %v1455_v18 }
 0x29b   :  { %1184 = vmatpush3.bf16.msra.mxu0 %v1329_v25 }
 0x29c   :  { %1185 = vmatprep.subr.bf16.mxu0 %v1455_v18 }
 0x29f   :  { %1186 = vmatpush3.bf16.msra.mxu0 %v1330_v26 }
 0x2a0   :  { %1191 = vmatprep.subr.bf16.mxu0 %v1455_v18 }
 0x35d   :  { %v1735_v27 = vpop.f32.mrb[4].mxu0 }
 0x35e   :  { %v719_v28 = vsel %vm718_vm8, %v1735_v27, 0.0  ;;  %v726_v29 = vmul.f32 %v1735_v27, %v1735_v27  ;;  %v714_v30 = vpop.f32.mrb[5].mxu0 }
 0x35f   :  { %v720_v31 = vrot.slane %v719_v28, 4  ;;  %v715_v32 = vpop.f32.mrb[6].mxu0 }
 0x360   :  { %v727_v33 = vsel %vm718_vm8, %v726_v29, 0.0  ;;  %v716_v34 = vpop.f32.mrb[7].mxu0 }
 0x361   :  { %v721_v35 = vadd.f32 %v720_v31, %v719_v28  ;;  %v728_v36 = vrot.slane %v727_v33, 4 }
 0x363   :  { %v722_v37 = vrot.slane %v721_v35, 2  ;;  %v729_v38 = vadd.f32 %v728_v36, %v727_v33 }
 0x365   :  { %v723_v45 = vadd.f32 %v722_v37, %v721_v35  ;;  %v730_v46 = vrot.slane %v729_v38, 2 }
 0x367   :  { %v724_v47 = vrot.slane %v723_v45, 1  ;;  %v731_v48 = vadd.f32 %v730_v46, %v729_v38 }
 0x369   :  { %v732_v49 = vrot.slane %v731_v48, 1  ;;  %v725_v50 = vadd.f32 %v724_v47, %v723_v45 }
 0x36b   :  { %v733_v51 = vadd.f32 %v732_v49, %v731_v48 }
 0x36d   :  { %v734_v52 = vsel %vm239_vm3, %v725_v50, %v733_v51 }
 0x36e   :  { %v747_v53 = vpack.c.bf16 %v734_v52, %v734_v52 }
 0x370   :  { %v748_v54 = vunpack.c.l.bf16 %v747_v53 }
 0x372   :  { %v749_v55 = vsub.f32 %v734_v52, %v748_v54 }
 0x374   :  { %v750_v56 = vpack.c.bf16 %v749_v55, %v749_v55 }
 0x376   :  { %1188 = vmatmul.mubr.msk.bf16.vlgmr.msra.gmra.mrb[8].mxu0 %vm162_vm0, %v750_v56 }
 0x377   :  { %1192 = vmatpush3.bf16.msra.mxu0 %v1325_v17  ;;  %1203 = vmatprep.mubr.msk.bf16.mxu0 %vm1456_vm7, %v1455_v18 }
 0x378   :  { %1193 = vmatprep.subr.bf16.mxu0 %v1455_v18 }
 0x37b   :  { %1194 = vmatpush3.bf16.msra.mxu0 %v1326_v21 }
 0x37c   :  { %1195 = vmatprep.subr.bf16.mxu0 %v1455_v18 }
 0x37f   :  { %1196 = vmatpush3.bf16.msra.mxu0 %v1327_v22 }
 0x380   :  { %1197 = vmatprep.subr.bf16.mxu0 %v1455_v18 }
 0x383   :  { %1198 = vmatpush3.bf16.msra.mxu0 %v1328_v24 }
 0x384   :  { %1199 = vmatprep.subr.bf16.mxu0 %v1455_v18 }
 0x387   :  { %1200 = vmatpush3.bf16.msra.mxu0 %v1329_v25 }
 0x388   :  { %1201 = vmatprep.subr.bf16.mxu0 %v1455_v18 }
 0x38b   :  { %1202 = vmatpush3.bf16.msra.mxu0 %v1330_v26 }
 0x38c   :  { %1223 = vmatprep.subr.bf16.mxu0 %v1455_v18 }
 0x38e   :  { %1204 = vmatmul.mubr.msk.bf16.vlgmr.msra.gmra.mrb[8].mxu0 %vm162_vm0, %v747_v53 }
 0x38f   :  { %1235 = vmatprep.mubr.msk.bf16.mxu0 %vm1456_vm7, %v1455_v18  ;;  %1224 = vmatpush3.bf16.msra.mxu0 %v1331_v57 }
 0x390   :  { %1225 = vmatprep.subr.bf16.mxu0 %v1455_v18 }
 0x393   :  { %1226 = vmatpush3.bf16.msra.mxu0 %v1332_v39 }
 0x394   :  { %1227 = vmatprep.subr.bf16.mxu0 %v1455_v18 }
 0x461   :  { %v867_v58 = vpop.f32.mrb[8].mxu0 }
 0x462   :  { %v873_v59 = vmul.f32 0.0052083335, %v867_v58  ;;  %v1205_v61 = vpop.f32.mrb[9].mxu0 }
 0x463   :  { %v870_v62 = vpop.f32.mrb[10].mxu0 }
 0x464   :  { %v874_v63 = vmul.f32 %v873_v59, %v873_v59  ;;  %v1206_v1 = vpop.f32.mrb[11].mxu0 }
 0x466   :  { %v876_v2 = vrot.slane %v874_v63, 7 }
 0x468   :  { %v878_v3 = vsub.f32 %v873_v59, %v876_v2 }
 0x46a   :  { %v880_v4 = vadd.f32 1e-05, %v878_v3 }
 0x46c   :  { %1341 = vrsqrt.f32 %v880_v4 }
 0x476   :  { %v1342_v6 = vpop.eup %1341 }
 0x477   :  { %v883_v8 = vrot.slane %v1342_v6, 1 }
 0x479   :  { %v885_v10 = vmul.f32 %v883_v8, %v879_v7 }
 0x47b   :  { %v886_v12 = vmul.f32 %v885_v10, %v873_v59  ;;  %v894_v16 = vrot.slane %v885_v10, %v1692_v60  ;;  %v1333_v60 = vld [vmem:[#allocation7 + $0x10] sm:$0xff]  }
 0x47c   :  { %1228 = vmatpush3.bf16.msra.mxu0 %v1333_v60  ;;  %1212 = vmatpush3.bf16.msra.mxu1 %v1333_v60 }
 0x47d   :  { %v888_v20 = vrot.slane %v886_v12, 7  ;;  %v895_v23 = vmul.f32 %v894_v16, %v1735_v27  ;;  %1229 = vmatprep.subr.bf16.mxu0 %v1455_v18  ;;  %1213 = vmatprep.subr.bf16.mxu1 %v1455_v18 }
 0x47f   :  { %v890_v41 = vsub.f32 %v879_v7, %v888_v20 }
 0x481   :  { %v899_v43 = vrot.slane %v890_v41, %v1699_v15  ;;  %v1334_v15 = vld [vmem:[#allocation7 + $0x18] sm:$0xff]  }
 0x482   :  { %1230 = vmatpush3.bf16.msra.mxu0 %v1334_v15  ;;  %1214 = vmatpush3.bf16.msra.mxu1 %v1334_v15 }
 0x483   :  { %v1772_v9 = vadd.f32 %v899_v43, %v895_v23  ;;  %1231 = vmatprep.subr.bf16.mxu0 %v1455_v18  ;;  %1215 = vmatprep.subr.bf16.mxu1 %v1455_v18 }
 0x485   :  { %v909_v42 = vsel %vm1768_vm10, -1e+30, %v1772_v9  ;;  %v1060_v53 = vmin.f32 %v1772_v9, 0.0 }
 0x486   :  { %v910_v0 = vsel %vm718_vm8, %v909_v42, -inf  ;;  %1232 = vmatpush3.bf16.msra.mxu0 %v1335_v11  ;;  %1216 = vmatpush3.bf16.msra.mxu1 %v1335_v11 }
 0x487   :  { %911 = vmax.xlane.f32.xlu0 %v910_v0  ;;  %1233 = vmatprep.subr.bf16.mxu0 %v1455_v18 }
 0x488   :  { %1217 = vmatprep.subr.bf16.mxu1 %v1455_v18  ;;  %v1061_v18 = vand.u32 2147483647, %v1772_v9 }
 0x48a   :  { %1234 = vmatpush3.bf16.msra.mxu0 %v1336_v13  ;;  %1218 = vmatpush3.bf16.msra.mxu1 %v1336_v13  ;;  %v1062_v29 = vsub.f32 0.0, %v1061_v18 }
 0x48c   :  { %v1063_v30 = vmul.f32 1.442695, %v1062_v29 }
 0x514   :  { %v912_v14 = vpop.xlane.xlu0 %911 }
 0x515   :  { %v913_v17 = vsub.f32 %v909_v42, %v912_v14 }
 0x517   :  { %v914_v21 = vmul.f32 1.442695, %v913_v17 }
 0x519   :  { %1343 = vpow2.f32 %v914_v21 }
 0x51a   :  { %1345 = vpow2.f32 %v1063_v30 }
 0x523   :  { %v1344_v22 = vpop.eup %1343 }
 0x524   :  { %v916_v24 = vsel %vm1768_vm10, 0.0, %v1344_v22  ;;  %v1346_v33 = vpop.eup %1345 }
 0x525   :  { %v929_v25 = vpack.c.bf16 %v916_v24, %v916_v24  ;;  %v1065_v36 = vadd.f32 1.0, %v1346_v33 }
 0x527   :  { %v930_v26 = vunpack.c.l.bf16 %v929_v25  ;;  %1236 = vmatmul.mubr.msk.bf16.vlgmr.msra.gmra.mrb[12].mxu0 %vm162_vm0, %v929_v25  ;;  %1347 = vlog2.f32 %v1065_v36 }
 0x529   :  { %v931_v27 = vsub.f32 %v916_v24, %v930_v26 }
 0x52b   :  { %v932_v28 = vpack.c.bf16 %v931_v27, %v931_v27 }
 0x52d   :  { %1220 = vmatmul.mubr.msk.bf16.vlgmr.msra.gmra.mrb[4].mxu1 %vm162_vm0, %v932_v28 }
 0x531   :  { %v1348_v49 = vpop.eup %1347 }
 0x532   :  { %v1067_v52 = vmul.f32 0.6931472, %v1348_v49 }
 0x534   :  { %v1068_v56 = vsub.f32 %v1060_v53, %v1067_v52 }
 0x5fa   :  { %v1049_v31 = vpop.f32.mrb[12].mxu0 }
 0x5fb   :  { %v1237_v32 = vpop.f32.mrb[13].mxu0 }
 0x5fc   :  { %v1052_v34 = vpop.f32.mrb[14].mxu0 }
 0x5fd   :  { %v1238_v35 = vpop.f32.mrb[15].mxu0 }
 0x600   :  { %v1006_v37 = vpop.f32.mrb[4].mxu1 }
 0x601   :  { %v1050_v38 = vadd.f32 %v1049_v31, %v1006_v37  ;;  %v1221_v45 = vpop.f32.mrb[5].mxu1 }
 0x602   :  { %v1009_v46 = vpop.f32.mrb[6].mxu1 }
 0x603   :  { %v1055_v47 = vadd.f32 1e-30, %v1050_v38  ;;  %v1222_v48 = vpop.f32.mrb[7].mxu1 }
 0x605   :  { %1349 = vlog2.f32 %v1055_v47 }
 0x60f   :  { %v1350_v50 = vpop.eup %1349 }
 0x610   :  { %v1057_v51 = vmul.f32 0.6931472, %v1350_v50 }
 0x612   :  { %v1058_v54 = vadd.f32 %v1057_v51, %v912_v14 }
 0x614   :  { %v1059_v55 = vsub.f32 %v1772_v9, %v1058_v54 }
 0x616   :  { %v1069_v57 = vsel %vm1768_vm10, %v1068_v56, %v1059_v55 }
 0x617   :  { %1070 = vst.msk [vmem:[%s1808_s9] sm:$0x3] %vm718_vm8, %v1069_v57 }
 0x618   :  { %1075 = vsyncpa [#allocation3], 1 }
 0x619   :  { %1076 = vsyncpa [#allocation5], 1 }
 0x61a   :  { %1077 = vsyncpa [#allocation8], 1 }

</bundles_post_ra>
